<compile_context>
chip_gen: v7x
topology: tpu7x:2x2x1
jax: 0.10.0
libtpu: 0.0.40
codegen_flags: <defaults>
</compile_context>

<pallas_src>
import math

import jax
import jax.numpy as jnp
from jax.experimental import pallas as pl
from jax.experimental.pallas import tpu as pltpu


def _add_pe_kernel(x_ref, pe_ref, o_ref):
    # x_ref / o_ref: (tb, tc) tile of the flattened (B, S*D) input/output.
    # pe_ref: full (1, C_padded) positional table, resident in VMEM.
    tc = o_ref.shape[-1]
    c0 = pl.multiple_of(pl.program_id(1) * tc, 128)
    o_ref[...] = x_ref[...] + pe_ref[:, pl.ds(c0, tc)]


def make_positional_encoding(d_model: int, max_len: int = 100) -> jnp.ndarray:
    """Builds the pe buffer exactly as the PyTorch __init__ does: (1, max_len, d_model)."""
    position = jnp.arange(max_len, dtype=jnp.float32)[:, None]                # (max_len, 1)
    div_term = jnp.exp(
        jnp.arange(0, d_model, 2, dtype=jnp.float32) * (-math.log(10000.0) / d_model)
    )                                                                         # (ceil(d/2),)
    angles = position * div_term                                              # (max_len, d/2)
    pe = jnp.zeros((max_len, d_model), dtype=jnp.float32)
    pe = pe.at[:, 0::2].set(jnp.sin(angles))
    pe = pe.at[:, 1::2].set(jnp.cos(angles)[:, : d_model // 2])
    return pe[None, :, :]


def positional_encoding_forward(
    x: jnp.ndarray, pe: jnp.ndarray, *, target_block_bytes: int = 1 << 20
) -> jnp.ndarray:
    """x: (B, S, D); pe: (1, max_len, D). Returns x + pe[:, :S] (dropout = eval/identity)."""
    B, S, D = x.shape
    C = S * D
    itemsize = jnp.dtype(x.dtype).itemsize

    # Glue: lane-dense 2-D views; pe pre-cast to x.dtype (single VMEM copy later).
    x2 = x.reshape(B, C)
    pe2 = pe[0, :S, :].astype(x.dtype).reshape(1, C)

    # Batch (sublane) tile: 8 rows when that tiles B, else the full batch
    # (block dims must be a multiple of 8 or the full extent).
    tb = 8 if (B > 8 and B % 8 == 0) else B

    # Lane tile: multiple of 128, sized so one block is ~target_block_bytes.
    max_tc = max(128, (target_block_bytes // (tb * itemsize)) // 128 * 128)
    tc = C if C <= max_tc else max_tc

    nb = pl.cdiv(B, tb)
    nc = pl.cdiv(C, tc)

    # Pad the (tiny) pe row so in-kernel lane slices never read out of bounds
    # at a ragged tail; the x / out ragged tails are masked by Pallas itself.
    c_pad = nc * tc
    if c_pad != C:
        pe2 = jnp.pad(pe2, ((0, 0), (0, c_pad - C)))

    flops = B * C                                     # one add per element
    bytes_accessed = (2 * B * C + C) * itemsize       # read x + pe, write out

    out2 = pl.pallas_call(
        _add_pe_kernel,
        out_shape=jax.ShapeDtypeStruct((B, C), x.dtype),
        grid_spec=pl.GridSpec(
            grid=(nb, nc),
            in_specs=[
                pl.BlockSpec((tb, tc), lambda i, j: (i, j)),
                # pe: tiny, single resident VMEM copy (no double-buffering).
                pl.BlockSpec(memory_space=pltpu.MemorySpace.VMEM),
            ],
            out_specs=pl.BlockSpec((tb, tc), lambda i, j: (i, j)),
        ),
        compiler_params=pltpu.CompilerParams(
            dimension_semantics=("parallel", "parallel"),
            vmem_limit_bytes=32 * 1024 * 1024,
        ),
        cost_estimate=pl.CostEstimate(
            flops=flops, transcendentals=0, bytes_accessed=bytes_accessed
        ),
    )(x2, pe2)

    return out2.reshape(B, S, D)


if __name__ == "__main__":
    # Small shapes consistent with the module's forward: (batch, seq, d_model)
    B, S, D = 2, 8, 32
    MAX_LEN = 100

    key = jax.random.PRNGKey(0)
    x = jax.random.normal(key, (B, S, D), dtype=jnp.float32)

    pe = make_positional_encoding(D, MAX_LEN)

    out = positional_encoding_forward(x, pe)
    out = jax.block_until_ready(out)

    # Reference check in plain JAX
    ref = x + pe[:, :S, :]
    assert out.shape == (B, S, D)
    assert jnp.allclose(out, ref, atol=1e-6, rtol=1e-6)

    print("KERNEL_OK")
</pallas_src>

<mosaic_0001>
module attributes {stable_mosaic.version = 11 : i64} {
  func.func @_add_pe_kernel(%arg0: i32, %arg1: i32, %arg2: memref<2x256xf32, #tpu.memory_space<vmem>>, %arg3: memref<1x256xf32, #tpu.memory_space<vmem>>, %arg4: memref<2x256xf32, #tpu.memory_space<vmem>>) attributes {dimension_semantics = [#tpu.dimension_semantics<parallel>, #tpu.dimension_semantics<parallel>], iteration_bounds = array<i64: 1, 1>, scalar_prefetch = 0 : i64, scratch_operands = 0 : i64, tpu.core_type = #tpu.core_type<tc>, window_params = [{transform_indices = @transform_0, window_bounds = array<i64: 2, 256>}, {pipeline_mode = #tpu.pipeline_mode<synchronous>, transform_indices = @transform_1, window_bounds = array<i64: 1, 256>}, {transform_indices = @transform_2, window_bounds = array<i64: 2, 256>}]} {
    %c256_i32 = arith.constant 256 : i32
    %0 = arith.muli %arg1, %c256_i32 : i32
    %1 = tpu.assume_multiple %0, 128 : i32
    %c0 = arith.constant 0 : index
    %c0_0 = arith.constant 0 : index
    %2 = vector.load %arg2[%c0, %c0_0] : memref<2x256xf32, #tpu.memory_space<vmem>>, vector<2x256xf32>
    %c0_1 = arith.constant 0 : index
    %3 = arith.index_cast %1 : i32 to index
    %4 = vector.load %arg3[%c0_1, %3] : memref<1x256xf32, #tpu.memory_space<vmem>>, vector<1x256xf32>
    %5 = vector.broadcast %4 : vector<1x256xf32> to vector<2x256xf32>
    %6 = arith.addf %2, %5 : vector<2x256xf32>
    %c0_2 = arith.constant 0 : index
    %c0_3 = arith.constant 0 : index
    %7 = vector.load %arg4[%c0_2, %c0_3] : memref<2x256xf32, #tpu.memory_space<vmem>>, vector<2x256xf32>
    tpu.vector_store %arg4[%c0_2, %c0_3], %6 {strides = array<i32>} : memref<2x256xf32, #tpu.memory_space<vmem>>, vector<2x256xf32>,
    return
  }
  func.func @transform_0(%arg0: i32, %arg1: i32) -> (i32, i32) {
    %c0_i32 = arith.constant 0 : i32
    return %arg0, %arg1 : i32, i32
  }
  func.func @transform_1(%arg0: i32, %arg1: i32) -> (i32, i32) {
    %c0_i32 = arith.constant 0 : i32
    %c0_i32_0 = arith.constant 0 : i32
    %c0_i32_1 = arith.constant 0 : i32
    return %c0_i32, %c0_i32_0 : i32, i32
  }
  func.func @transform_2(%arg0: i32, %arg1: i32) -> (i32, i32) {
    %c0_i32 = arith.constant 0 : i32
    return %arg0, %arg1 : i32, i32
  }
}

</mosaic_0001>

<bundles_post_ra>
// kernel: tpu_custom_call.1
= control target key start
LH: loop header
LB: loop body
LE: loop exit
PB: predicated region body
PF: predicated region fallthrough
CT: control target
= control target key end

     0   :  { %7 = vsyncpa [#allocation3], 0  ;;  %s162_s0 = inlined_call_operand.hbm [shape: f32[2,256], index: 0, kind: input, shape index: {}]   ;;  %s163_s1 = inlined_call_operand.vmem [shape: f32[1,256], index: 1, kind: input, shape index: {}]   ;;  %s164_s2 = inlined_call_operand.hbm [shape: f32[2,256], index: 2, kind: output, shape index: {}]  }
   0x1   :  { %8 = vsyncpa [#allocation4], 0  ;;  %s117_s9 = smov [#allocation2]   ;;  %s69_s13 = scalar_lea.hbm %s162_s0, 64 }
   0x2   :  { %s15_s10 = sshll.u32 %s117_s9, 4  ;;  %p70_p0 = scmp.ne.s32.totalorder %s162_s0, %s69_s13  ;;  %s16_s10 = int_to_ptr.vmem [resolvable:$true] %s15_s10 }
   0x3   :  { %p73_p1 = scmp.lt.u32.totalorder %s69_s13, %s162_s0 }
   0x5   :  { %p75_p2 = pnand %p73_p1, %p70_p0 }
   0x7   :  { %78 = shalt.err (!%p75_p2)
}
   0x8   :  { %s79_s18 = scalar_lea.vmem %s16_s10, 64  ;;  %p84_p4 = scmp.lt.s32.totalorder %s16_s10, %s16_s10 }
   0x9   :  { %p80_p3 = scmp.ne.s32.totalorder %s16_s10, %s79_s18  ;;  %p85_p5 = scmp.lt.s32.totalorder %s79_s18, %s79_s18 }
   0xb   :  { %p86_p6 = por %p85_p5, %p84_p4 }
   0xd   :  { %p87_p7 = pnand %p86_p6, %p80_p3 }
   0xf   :  { %90 = shalt.err (!%p87_p7)
}
  0x10   :  { %18 = dma.hbm_to_vmem [thread:$0]  %s162_s0, 64, %s16_s10, [#allocation3]  }
  0x11   :  { %113 = dma.done.wait [#allocation3], 64  }
  0x12   :  { %114 = vsyncadd [#allocation3], 4294967232  ;;  %v31_v0 = vlaneseq  ;;  %v118_v1 = vmov 1983009808   ;;  %v29_v7 = vld [vmem:[%s163_s1] sm:$0x3] }
  0x13   :  { %v41_v2 = vunpack.c.l.s4 %v118_v1  ;;  %v25_v12 = vld [vmem:[#allocation2] sm:$0xf]  ;;  %s119_s23 = smov [#allocation5]  }
  0x14   :  { %v32_v3 = vshrl.u32 %v31_v0, 7  ;;  %s56_s0 = sshll.u32 %s119_s23, 4  ;;  %s57_s0 = int_to_ptr.vmem [resolvable:$true] %s56_s0 }
  0x15   :  { %v42_v6 = vunpack.c.0.s8 %v41_v2  ;;  %s91_s24 = scalar_lea.vmem %s57_s0, 64  ;;  %p96_p9 = scmp.lt.s32.totalorder %s57_s0, %s57_s0 }
  0x16   :  { %v33_v4 = vsub.s32 0, %v32_v3  ;;  %v37_v5 = vsub.s32 1, %v32_v3  ;;  %p92_p8 = scmp.ne.s32.totalorder %s57_s0, %s91_s24  ;;  %p97_p10 = scmp.lt.s32.totalorder %s91_s24, %s91_s24 }
  0x17   :  { %v45_v10 = vsub.s32 %v42_v6, %v32_v3 }
  0x18   :  { %v34_v8 = vrot.slane %v29_v7, %v33_v4  ;;  %v38_v9 = vrot.slane %v29_v7, %v37_v5  ;;  %p98_p11 = por %p97_p10, %p96_p9 }
  0x1a   :  { %v39_v11 = vcombine.low %v34_v8, %v38_v9  ;;  %p99_p12 = pnand %p98_p11, %p92_p8 }
  0x1c   :  { %v46_v13 = vrot.slane %v39_v11, %v45_v10 }
  0x1e   :  { %v48_v14 = vadd.f32 %v46_v13, %v25_v12 }
  0x20   :  { %49 = vst [vmem:[#allocation5] sm:$0xf] %v48_v14 }
  0x21   :  { %102 = shalt.err (!%p99_p12)
}
  0x22   :  { %s103_s26 = scalar_lea.hbm %s164_s2, 64 }
  0x23   :  { %p104_p13 = scmp.ne.s32.totalorder %s164_s2, %s103_s26  ;;  %p107_p0 = scmp.lt.u32.totalorder %s103_s26, %s164_s2 }
  0x25   :  { %p109_p1 = pnand %p107_p0, %p104_p13 }
  0x27   :  { %112 = shalt.err (!%p109_p1)
}
  0x28   :  { %59 = dma.vmem_to_hbm [thread:$0]  %s57_s0, 64, %s164_s2, [#allocation4]  }
  0x29   :  { %115 = dma.done.wait [#allocation4], 64  }
  0x2a   :  { %116 = vsyncadd [#allocation4], 4294967232 }
  0x2b   :  { %63 = vsyncpa [#allocation3], 1 }
  0x2c   :  { %64 = vsyncpa [#allocation4], 1 }

</bundles_post_ra>
